<compile_context>
chip_gen: v5e
topology: v5e:2x2
jax: 0.10.0
libtpu: 0.0.40
codegen_flags: <defaults>
</compile_context>

<pallas_src>
import jax
import jax.numpy as jnp
from jax.experimental import pallas as pl
from jax.experimental.pallas import tpu as pltpu

LANE = 128  # TPU lane width; batch tiles must be multiples of this.

# Packed parameter layout (all float32, total 21 scalars):
#   [0:10]  w1 (5,2) row-major  -> w1[k, j] at 2*k + j
#   [10:15] b1 (5,)             -> b1[k]    at 10 + k
#   [15:20] w2 (1,5)            -> w2[0, k] at 15 + k
#   [20]    b2 (1,)             -> b2       at 20


def mlp_kernel(params_ref, x_ref, o_ref):
    # x_ref: (2, TILE_B) f32 in VMEM, batch on the lane axis.
    # params_ref: (21,) f32 in SMEM -> scalar reads broadcast into vregs.
    x = x_ref[...]
    x0 = x[0:1, :]                      # (1, TILE_B)
    x1 = x[1:2, :]                      # (1, TILE_B)

    acc = jnp.zeros_like(x0)            # accumulates layer-2 weighted sum
    for k in range(5):                  # unrolled: 5 hidden units
        h_k = params_ref[2 * k] * x0 + params_ref[2 * k + 1] * x1 + params_ref[10 + k]
        h_k = jnp.maximum(h_k, 0.0)     # ReLU
        acc = acc + params_ref[15 + k] * h_k
    y = acc + params_ref[20]            # (1, TILE_B)

    # sigmoid(y) = 1 / (1 + exp(-y)); exp and approx reciprocal both run on the EUP.
    e = jnp.exp(-y)
    o_ref[...] = pl.reciprocal(1.0 + e, approx=True)


def _round_up(n, m):
    return ((n + m - 1) // m) * m


def mlp_forward(x, packed_params, *, tile_b=1024):
    """x: (B, 2) f32, packed_params: (21,) f32. Returns (B, 1) f32."""
    B = x.shape[0]
    # Don't tile larger than the (lane-rounded) batch; keep tile a multiple of 128.
    tile_b = min(tile_b, _round_up(max(B, 1), LANE))
    Bp = _round_up(B, tile_b)

    # Batch on the lane axis, zero-padded to the tile boundary.
    xt = jnp.zeros((2, Bp), jnp.float32).at[:, :B].set(x.T.astype(jnp.float32))

    out_t = pl.pallas_call(
        mlp_kernel,
        out_shape=jax.ShapeDtypeStruct((1, Bp), jnp.float32),
        grid=(Bp // tile_b,),
        in_specs=[
            # Whole packed-parameter vector lives in SMEM (one tiny DMA).
            pl.BlockSpec(memory_space=pltpu.MemorySpace.SMEM),
            # x tile: (2, TILE_B); first dim equals full array dim, lane dim % 128 == 0.
            pl.BlockSpec((2, tile_b), lambda i: (0, i)),
        ],
        out_specs=pl.BlockSpec((1, tile_b), lambda i: (0, i)),
        compiler_params=pltpu.CompilerParams(
            dimension_semantics=("parallel",),  # batch tiles split across TCs on v7x
        ),
    )(packed_params, xt)

    # Back to the PyTorch-facing (B, 1) layout (wrapper-side layout plumbing only).
    return out_t[:, :B].T


def init_params(key):
    # torch.nn.Linear default init: uniform(-1/sqrt(fan_in), +1/sqrt(fan_in)),
    # weights kept in PyTorch layout (out_features, in_features).
    k1, k2, k3, k4 = jax.random.split(key, 4)
    lim1 = 1.0 / jnp.sqrt(2.0)
    lim2 = 1.0 / jnp.sqrt(5.0)
    w1 = jax.random.uniform(k1, (5, 2), jnp.float32, -lim1, lim1)
    b1 = jax.random.uniform(k2, (5,), jnp.float32, -lim1, lim1)
    w2 = jax.random.uniform(k3, (1, 5), jnp.float32, -lim2, lim2)
    b2 = jax.random.uniform(k4, (1,), jnp.float32, -lim2, lim2)
    return w1, b1, w2, b2


def pack_params(w1, b1, w2, b2):
    return jnp.concatenate(
        [w1.reshape(-1), b1.reshape(-1), w2.reshape(-1), b2.reshape(-1)]
    ).astype(jnp.float32)


if __name__ == "__main__":
    key = jax.random.PRNGKey(0)
    kx, kp = jax.random.split(key)
    batch = 8
    x = jax.random.normal(kx, (batch, 2), jnp.float32)
    w1, b1, w2, b2 = init_params(kp)
    params = pack_params(w1, b1, w2, b2)

    out = mlp_forward(x, params)
    out = jax.block_until_ready(out)

    # Reference in plain JAX (PyTorch semantics: x @ W.T + b).
    ref = jax.nn.sigmoid(jnp.maximum(x @ w1.T + b1, 0.0) @ w2.T + b2)
    assert out.shape == (batch, 1)
    # Slightly loose tolerance because of the EUP approximate reciprocal.
    assert jnp.allclose(out, ref, atol=1e-3, rtol=1e-3)

    print("KERNEL_OK")
</pallas_src>

<mosaic_0001>
module attributes {stable_mosaic.version = 11 : i64} {
  func.func @mlp_kernel(%arg0: i32, %arg1: memref<21xf32, #tpu.memory_space<smem>>, %arg2: memref<2x128xf32, #tpu.memory_space<vmem>>, %arg3: memref<1x128xf32, #tpu.memory_space<vmem>>) attributes {dimension_semantics = [#tpu.dimension_semantics<parallel>], iteration_bounds = array<i64: 1>, scalar_prefetch = 0 : i64, scratch_operands = 0 : i64, tpu.core_type = #tpu.core_type<tc>, window_params = [{transform_indices = @transform_0, window_bounds = array<i64: 21>}, {transform_indices = @transform_1, window_bounds = array<i64: 2, 128>}, {transform_indices = @transform_2, window_bounds = array<i64: 1, 128>}]} {
    %c0 = arith.constant 0 : index
    %c0_0 = arith.constant 0 : index
    %0 = vector.load %arg2[%c0, %c0_0] : memref<2x128xf32, #tpu.memory_space<vmem>>, vector<2x128xf32>
    %1 = vector.extract_strided_slice %0 {offsets = [0, 0], sizes = [1, 128], strides = [1, 1]} : vector<2x128xf32> to vector<1x128xf32>
    %2 = vector.extract_strided_slice %0 {offsets = [1, 0], sizes = [1, 128], strides = [1, 1]} : vector<2x128xf32> to vector<1x128xf32>
    %cst = arith.constant 0.000000e+00 : f32
    %3 = vector.broadcast %cst : f32 to vector<1x128xf32>
    %c0_1 = arith.constant 0 : index
    %4 = memref.load %arg1[%c0_1] : memref<21xf32, #tpu.memory_space<smem>>
    %5 = vector.broadcast %4 : f32 to vector<1x128xf32>
    %6 = arith.mulf %5, %1 : vector<1x128xf32>
    %c1 = arith.constant 1 : index
    %7 = memref.load %arg1[%c1] : memref<21xf32, #tpu.memory_space<smem>>
    %8 = vector.broadcast %7 : f32 to vector<1x128xf32>
    %9 = arith.mulf %8, %2 : vector<1x128xf32>
    %10 = arith.addf %6, %9 : vector<1x128xf32>
    %c10 = arith.constant 10 : index
    %11 = memref.load %arg1[%c10] : memref<21xf32, #tpu.memory_space<smem>>
    %12 = vector.broadcast %11 : f32 to vector<1x128xf32>
    %13 = arith.addf %10, %12 : vector<1x128xf32>
    %cst_2 = arith.constant 0.000000e+00 : f32
    %14 = vector.broadcast %cst_2 : f32 to vector<1x128xf32>
    %15 = arith.maximumf %13, %14 : vector<1x128xf32>
    %c15 = arith.constant 15 : index
    %16 = memref.load %arg1[%c15] : memref<21xf32, #tpu.memory_space<smem>>
    %17 = vector.broadcast %16 : f32 to vector<1x128xf32>
    %18 = arith.mulf %17, %15 : vector<1x128xf32>
    %19 = arith.addf %3, %18 : vector<1x128xf32>
    %c2 = arith.constant 2 : index
    %20 = memref.load %arg1[%c2] : memref<21xf32, #tpu.memory_space<smem>>
    %21 = vector.broadcast %20 : f32 to vector<1x128xf32>
    %22 = arith.mulf %21, %1 : vector<1x128xf32>
    %c3 = arith.constant 3 : index
    %23 = memref.load %arg1[%c3] : memref<21xf32, #tpu.memory_space<smem>>
    %24 = vector.broadcast %23 : f32 to vector<1x128xf32>
    %25 = arith.mulf %24, %2 : vector<1x128xf32>
    %26 = arith.addf %22, %25 : vector<1x128xf32>
    %c11 = arith.constant 11 : index
    %27 = memref.load %arg1[%c11] : memref<21xf32, #tpu.memory_space<smem>>
    %28 = vector.broadcast %27 : f32 to vector<1x128xf32>
    %29 = arith.addf %26, %28 : vector<1x128xf32>
    %cst_3 = arith.constant 0.000000e+00 : f32
    %30 = vector.broadcast %cst_3 : f32 to vector<1x128xf32>
    %31 = arith.maximumf %29, %30 : vector<1x128xf32>
    %c16 = arith.constant 16 : index
    %32 = memref.load %arg1[%c16] : memref<21xf32, #tpu.memory_space<smem>>
    %33 = vector.broadcast %32 : f32 to vector<1x128xf32>
    %34 = arith.mulf %33, %31 : vector<1x128xf32>
    %35 = arith.addf %19, %34 : vector<1x128xf32>
    %c4 = arith.constant 4 : index
    %36 = memref.load %arg1[%c4] : memref<21xf32, #tpu.memory_space<smem>>
    %37 = vector.broadcast %36 : f32 to vector<1x128xf32>
    %38 = arith.mulf %37, %1 : vector<1x128xf32>
    %c5 = arith.constant 5 : index
    %39 = memref.load %arg1[%c5] : memref<21xf32, #tpu.memory_space<smem>>
    %40 = vector.broadcast %39 : f32 to vector<1x128xf32>
    %41 = arith.mulf %40, %2 : vector<1x128xf32>
    %42 = arith.addf %38, %41 : vector<1x128xf32>
    %c12 = arith.constant 12 : index
    %43 = memref.load %arg1[%c12] : memref<21xf32, #tpu.memory_space<smem>>
    %44 = vector.broadcast %43 : f32 to vector<1x128xf32>
    %45 = arith.addf %42, %44 : vector<1x128xf32>
    %cst_4 = arith.constant 0.000000e+00 : f32
    %46 = vector.broadcast %cst_4 : f32 to vector<1x128xf32>
    %47 = arith.maximumf %45, %46 : vector<1x128xf32>
    %c17 = arith.constant 17 : index
    %48 = memref.load %arg1[%c17] : memref<21xf32, #tpu.memory_space<smem>>
    %49 = vector.broadcast %48 : f32 to vector<1x128xf32>
    %50 = arith.mulf %49, %47 : vector<1x128xf32>
    %51 = arith.addf %35, %50 : vector<1x128xf32>
    %c6 = arith.constant 6 : index
    %52 = memref.load %arg1[%c6] : memref<21xf32, #tpu.memory_space<smem>>
    %53 = vector.broadcast %52 : f32 to vector<1x128xf32>
    %54 = arith.mulf %53, %1 : vector<1x128xf32>
    %c7 = arith.constant 7 : index
    %55 = memref.load %arg1[%c7] : memref<21xf32, #tpu.memory_space<smem>>
    %56 = vector.broadcast %55 : f32 to vector<1x128xf32>
    %57 = arith.mulf %56, %2 : vector<1x128xf32>
    %58 = arith.addf %54, %57 : vector<1x128xf32>
    %c13 = arith.constant 13 : index
    %59 = memref.load %arg1[%c13] : memref<21xf32, #tpu.memory_space<smem>>
    %60 = vector.broadcast %59 : f32 to vector<1x128xf32>
    %61 = arith.addf %58, %60 : vector<1x128xf32>
    %cst_5 = arith.constant 0.000000e+00 : f32
    %62 = vector.broadcast %cst_5 : f32 to vector<1x128xf32>
    %63 = arith.maximumf %61, %62 : vector<1x128xf32>
    %c18 = arith.constant 18 : index
    %64 = memref.load %arg1[%c18] : memref<21xf32, #tpu.memory_space<smem>>
    %65 = vector.broadcast %64 : f32 to vector<1x128xf32>
    %66 = arith.mulf %65, %63 : vector<1x128xf32>
    %67 = arith.addf %51, %66 : vector<1x128xf32>
    %c8 = arith.constant 8 : index
    %68 = memref.load %arg1[%c8] : memref<21xf32, #tpu.memory_space<smem>>
    %69 = vector.broadcast %68 : f32 to vector<1x128xf32>
    %70 = arith.mulf %69, %1 : vector<1x128xf32>
    %c9 = arith.constant 9 : index
    %71 = memref.load %arg1[%c9] : memref<21xf32, #tpu.memory_space<smem>>
    %72 = vector.broadcast %71 : f32 to vector<1x128xf32>
    %73 = arith.mulf %72, %2 : vector<1x128xf32>
    %74 = arith.addf %70, %73 : vector<1x128xf32>
    %c14 = arith.constant 14 : index
    %75 = memref.load %arg1[%c14] : memref<21xf32, #tpu.memory_space<smem>>
    %76 = vector.broadcast %75 : f32 to vector<1x128xf32>
    %77 = arith.addf %74, %76 : vector<1x128xf32>
    %cst_6 = arith.constant 0.000000e+00 : f32
    %78 = vector.broadcast %cst_6 : f32 to vector<1x128xf32>
    %79 = arith.maximumf %77, %78 : vector<1x128xf32>
    %c19 = arith.constant 19 : index
    %80 = memref.load %arg1[%c19] : memref<21xf32, #tpu.memory_space<smem>>
    %81 = vector.broadcast %80 : f32 to vector<1x128xf32>
    %82 = arith.mulf %81, %79 : vector<1x128xf32>
    %83 = arith.addf %67, %82 : vector<1x128xf32>
    %c20 = arith.constant 20 : index
    %84 = memref.load %arg1[%c20] : memref<21xf32, #tpu.memory_space<smem>>
    %85 = vector.broadcast %84 : f32 to vector<1x128xf32>
    %86 = arith.addf %83, %85 : vector<1x128xf32>
    %cst_7 = arith.constant 0.000000e+00 : f32
    %87 = vector.broadcast %cst_7 : f32 to vector<1x128xf32>
    %88 = arith.subf %87, %86 : vector<1x128xf32>
    %89 = math.exp %88 : vector<1x128xf32>
    %cst_8 = arith.constant 1.000000e+00 : f32
    %90 = vector.broadcast %cst_8 : f32 to vector<1x128xf32>
    %91 = arith.addf %90, %89 : vector<1x128xf32>
    %92 = tpu.reciprocal %91 {approx = true} : vector<1x128xf32> -> vector<1x128xf32>
    %c0_9 = arith.constant 0 : index
    %c0_10 = arith.constant 0 : index
    %93 = vector.load %arg3[%c0_9, %c0_10] : memref<1x128xf32, #tpu.memory_space<vmem>>, vector<1x128xf32>
    tpu.vector_store %arg3[%c0_9, %c0_10], %92 {strides = array<i32>} : memref<1x128xf32, #tpu.memory_space<vmem>>, vector<1x128xf32>,
    return
  }
  func.func @transform_0(%arg0: i32) -> i32 {
    %c0_i32 = arith.constant 0 : i32
    %c0_i32_0 = arith.constant 0 : i32
    return %c0_i32 : i32
  }
  func.func @transform_1(%arg0: i32) -> (i32, i32) {
    %c0_i32 = arith.constant 0 : i32
    %c0_i32_0 = arith.constant 0 : i32
    return %c0_i32, %arg0 : i32, i32
  }
  func.func @transform_2(%arg0: i32) -> (i32, i32) {
    %c0_i32 = arith.constant 0 : i32
    %c0_i32_0 = arith.constant 0 : i32
    return %c0_i32, %arg0 : i32, i32
  }
}

</mosaic_0001>

<bundles_post_ra>
// kernel: tpu_custom_call.1
= control target key start
LH: loop header
LB: loop body
LE: loop exit
PB: predicated region body
PF: predicated region fallthrough
CT: control target
= control target key end

     0   :  { %7 = vsyncpa [#allocation5], 0  ;;  %s295_s0 = inlined_call_operand.hbm [shape: f32[21], index: 0, kind: input, shape index: {}]   ;;  %s296_s1 = inlined_call_operand.hbm [shape: f32[2,128], index: 1, kind: input, shape index: {}]   ;;  %s297_s2 = inlined_call_operand.hbm [shape: f32[1,128], index: 2, kind: output, shape index: {}]  }
   0x1   :  { %8 = vsyncpa [#allocation3], 0 }
   0x2   :  { %9 = vsyncpa [#allocation4], 0  ;;  %s15_s11 = sshll.u32 %s295_s0, 4  ;;  %s24_s14 = sshll.u32 %s296_s1, 4  ;;  %s16_s11 = int_to_ptr.hbm [resolvable:$true] %s15_s11  ;;  %s25_s14 = int_to_ptr.hbm [resolvable:$true] %s24_s14 }
   0x3   :  { %s250_s15 = smov [#allocation2]   ;;  %s251_s16 = smov [#allocation6]  }
   0x4   :  { %18 = dma.hbm_to_smem %s16_s11, 16, %s250_s15, [#allocation5]  }
   0x5   :  { %s26_s17 = sshll.u32 %s251_s16, 4  ;;  %s27_s17 = int_to_ptr.vmem [resolvable:$true] %s26_s17 }
   0x6   :  { %29 = dma.hbm_to_vmem [thread:$0]  %s25_s14, 32, %s27_s17, [#allocation3]  }
   0x7   :  { %244 = dma.done.wait [#allocation5], 16  }
   0x8   :  { %245 = vsyncadd [#allocation5], 4294967280 }
   0x9   :  { %246 = dma.done.wait [#allocation3], 32  }
   0xa   :  { %247 = vsyncadd [#allocation3], 4294967264 }
   0xb   :  { %38 = sfence }
   0xc   :  { %s40_s18 = sld [smem:[#allocation2]]  ;;  %v39_v0 = vld [vmem:[#allocation6] sm:$0x3]  ;;  %s252_s9 = smov [#allocation7]  }
   0xd   :  { %s157_s19 = sld [smem:[#allocation2 + $0x1]]  ;;  %s144_s10 = sshll.u32 %s252_s9, 4  ;;  %s145_s10 = int_to_ptr.vmem [resolvable:$true] %s144_s10 }
   0xe   :  { %s158_s0 = sld [smem:[#allocation2 + $0xa]]  ;;  %s146_s13 = sshll.u32 %s297_s2, 4  ;;  %s147_s13 = int_to_ptr.hbm [resolvable:$true] %s146_s13 }
   0xf   :  { %s160_s20 = sld [smem:[#allocation2 + $0x2]] }
  0x10   :  { %s161_s21 = sld [smem:[#allocation2 + $0x3]] }
  0x11   :  { %s274_s1 = sld [smem:[#allocation2 + $0xf]] }
  0x12   :  { %v41_v1 = vstv %s40_s18  ;;  %s162_s22 = sld [smem:[#allocation2 + $0xb]] }
  0x13   :  { %v44_v2 = vstv %s157_s19  ;;  %v42_v3 = vmul.f32 %v41_v1, %v39_v0  ;;  %s164_s23 = sld [smem:[#allocation2 + $0x4]] }
  0x14   :  { %v45_v4 = vmul.f32 %v44_v2, %v39_v0  ;;  %s165_s24 = sld [smem:[#allocation2 + $0x5]]  ;;  %v51_v7 = vstv %s158_s0 }
  0x15   :  { %v59_v6 = vstv %s160_s20  ;;  %s276_s25 = sld [smem:[#allocation2 + $0x10]] }
  0x16   :  { %v47_v5 = vrot.slane %v45_v4, 1  ;;  %v62_v8 = vstv %s161_s21  ;;  %s278_s26 = sld [smem:[#allocation2 + $0xc]]  ;;  %v60_v10 = vmul.f32 %v59_v6, %v39_v0 }
  0x17   :  { %v63_v11 = vmul.f32 %v62_v8, %v39_v0  ;;  %s168_s27 = sld [smem:[#allocation2 + $0x6]]  ;;  %v55_v15 = vstv %s274_s1 }
  0x18   :  { %v49_v9 = vadd.f32 %v47_v5, %v42_v3  ;;  %s169_s28 = sld [smem:[#allocation2 + $0x7]]  ;;  %v69_v16 = vstv %s162_s22 }
  0x19   :  { %v65_v13 = vrot.slane %v63_v11, 1  ;;  %v77_v14 = vstv %s164_s23  ;;  %s280_s29 = sld [smem:[#allocation2 + $0x11]] }
  0x1a   :  { %v52_v12 = vadd.f32 %v51_v7, %v49_v9  ;;  %v80_v17 = vstv %s165_s24  ;;  %s283_s30 = sld [smem:[#allocation2 + $0xd]]  ;;  %v78_v20 = vmul.f32 %v77_v14, %v39_v0 }
  0x1b   :  { %v67_v19 = vadd.f32 %v65_v13, %v60_v10  ;;  %v81_v21 = vmul.f32 %v80_v17, %v39_v0  ;;  %s172_s3 = sld [smem:[#allocation2 + $0x8]]  ;;  %v73_v26 = vstv %s276_s25 }
  0x1c   :  { %v53_v18 = vmax.f32 %v52_v12, 0.0  ;;  %s173_s4 = sld [smem:[#allocation2 + $0x9]]  ;;  %v87_v27 = vstv %s278_s26 }
  0x1d   :  { %v70_v22 = vadd.f32 %v69_v16, %v67_v19  ;;  %v83_v23 = vrot.slane %v81_v21, 1  ;;  %v95_v24 = vstv %s168_s27  ;;  %s285_s5 = sld [smem:[#allocation2 + $0x12]] }
  0x1e   :  { %v56_v25 = vmul.f32 %v55_v15, %v53_v18  ;;  %v98_v28 = vstv %s169_s28  ;;  %s174_s6 = sld [smem:[#allocation2 + $0xe]]  ;;  %v96_v31 = vmul.f32 %v95_v24, %v39_v0 }
  0x1f   :  { %v71_v29 = vmax.f32 %v70_v22, 0.0  ;;  %v85_v30 = vadd.f32 %v83_v23, %v78_v20  ;;  %v99_v32 = vmul.f32 %v98_v28, %v39_v0  ;;  %v91_v37 = vstv %s280_s29  ;;  %s175_s7 = sld [smem:[#allocation2 + $0x13]] }
  0x20   :  { %v105_v38 = vstv %s283_s30  ;;  %s176_s8 = sld [smem:[#allocation2 + $0x14]] }
  0x21   :  { %v74_v33 = vmul.f32 %v73_v26, %v71_v29  ;;  %v88_v34 = vadd.f32 %v87_v27, %v85_v30  ;;  %v101_v35 = vrot.slane %v99_v32, 1  ;;  %v113_v36 = vstv %s172_s3 }
  0x22   :  { %v114_v39 = vmul.f32 %v113_v36, %v39_v0  ;;  %v116_v40 = vstv %s173_s4 }
  0x23   :  { %v75_v41 = vadd.f32 %v74_v33, %v56_v25  ;;  %v89_v42 = vmax.f32 %v88_v34, 0.0  ;;  %v103_v43 = vadd.f32 %v101_v35, %v96_v31  ;;  %v117_v44 = vmul.f32 %v116_v40, %v39_v0 }
  0x24   :  { %v109_v48 = vstv %s285_s5  ;;  %v123_v49 = vstv %s174_s6 }
  0x25   :  { %v92_v45 = vmul.f32 %v91_v37, %v89_v42  ;;  %v106_v46 = vadd.f32 %v105_v38, %v103_v43  ;;  %v119_v47 = vrot.slane %v117_v44, 1  ;;  %v127_v55 = vstv %s175_s7 }
  0x26   :  { %v131_v59 = vstv %s176_s8 }
  0x27   :  { %v93_v50 = vadd.f32 %v92_v45, %v75_v41  ;;  %v107_v51 = vmax.f32 %v106_v46, 0.0  ;;  %v121_v52 = vadd.f32 %v119_v47, %v114_v39 }
  0x29   :  { %v110_v53 = vmul.f32 %v109_v48, %v107_v51  ;;  %v124_v54 = vadd.f32 %v123_v49, %v121_v52 }
  0x2b   :  { %v111_v56 = vadd.f32 %v110_v53, %v93_v50  ;;  %v125_v57 = vmax.f32 %v124_v54, 0.0 }
  0x2d   :  { %v128_v58 = vmul.f32 %v127_v55, %v125_v57 }
  0x2f   :  { %v129_v60 = vadd.f32 %v128_v58, %v111_v56 }
  0x31   :  { %v132_v61 = vadd.f32 %v131_v59, %v129_v60 }
  0x33   :  { %v133_v62 = vsub.f32 0.0, %v132_v61 }
  0x35   :  { %v134_v63 = vmul.f32 1.442695, %v133_v62 }
  0x37   :  { %180 = vpow2.f32 %v134_v63 }
  0x3d   :  { %v181_v0 = vpop.eup %180 }
  0x3e   :  { %v136_v1 = vadd.f32 1.0, %v181_v0 }
  0x40   :  { %182 = vrcp.f32 %v136_v1 }
  0x46   :  { %v183_v2 = vpop.eup %182 }
  0x47   :  { %138 = vst [vmem:[#allocation7] sm:$0x1] %v183_v2 }
  0x48   :  { %149 = dma.vmem_to_hbm [thread:$0]  %s145_s10, 16, %s147_s13, [#allocation4]  }
  0x49   :  { %248 = dma.done.wait [#allocation4], 16  }
  0x4a   :  { %249 = vsyncadd [#allocation4], 4294967280 }
  0x4b   :  { %154 = vsyncpa [#allocation3], 1 }
  0x4c   :  { %155 = vsyncpa [#allocation4], 1 }
  0x4d   :  { %156 = vsyncpa [#allocation5], 1 }

</bundles_post_ra>
